<compile_context>
chip_gen: v5e
topology: v5e:2x2
jax: 0.10.0
libtpu: 0.0.40
codegen_flags: <defaults>
</compile_context>

<pallas_src>
import jax
import jax.numpy as jnp
import numpy as np
from jax.experimental import pallas as pl
from jax.experimental.pallas import tpu as pltpu


# ---------------------------------------------------------------------------
# Path 1: zero-copy identity (output aliases input; no HBM traffic at all).
# ---------------------------------------------------------------------------
def _identity_alias_kernel(x_ref, o_ref):
    # o_ref aliases x_ref (same HBM buffer): nothing to compute, nothing to DMA.
    del x_ref, o_ref


def identity_pallas(x):
    """Identity with zero HBM traffic: the output buffer *is* the input buffer.

    For the full win the caller should donate `x`, e.g.
        jax.jit(identity_pallas, donate_argnums=0)(x)
    (without donation XLA inserts a single defensive copy to honor the alias,
    which already runs at ~HBM roofline).
    """
    return pl.pallas_call(
        _identity_alias_kernel,
        out_shape=jax.ShapeDtypeStruct(x.shape, x.dtype),
        in_specs=[pl.BlockSpec(memory_space=pl.ANY)],   # leave in HBM, no auto-DMA
        out_specs=pl.BlockSpec(memory_space=pl.ANY),
        input_output_aliases={0: 0},
    )(x)


# ---------------------------------------------------------------------------
# Path 2: fresh-output identity via direct HBM->HBM DMA (no VMEM staging).
# ---------------------------------------------------------------------------
# Only bother splitting into multiple concurrent DMAs once the array is large
# enough that descriptor overhead is negligible.
_CHUNK_THRESHOLD_BYTES = 8 * 1024 * 1024
_NUM_CHUNKS = 4


def _make_dma_copy_kernel(num_chunks, chunk_rows):
    """Build a kernel that copies x_hbm -> o_hbm with `num_chunks` DMAs."""
    if num_chunks == 1:
        def kernel(x_hbm, o_hbm, sem):
            cp = pltpu.make_async_copy(x_hbm, o_hbm, sem.at[0])
            cp.start()
            cp.wait()
        return kernel

    def kernel(x_hbm, o_hbm, sem):
        # Start all chunked DMAs back-to-back, then wait; leading dim is split
        # evenly so every slice is static-shaped.
        copies = []
        for i in range(num_chunks):
            start = i * chunk_rows
            cp = pltpu.make_async_copy(
                x_hbm.at[pl.ds(start, chunk_rows)],
                o_hbm.at[pl.ds(start, chunk_rows)],
                sem.at[i],
            )
            cp.start()
            copies.append(cp)
        for cp in copies:
            cp.wait()
    return kernel


def identity_copy_pallas(x):
    """Identity that materializes a new output buffer via pure HBM->HBM DMA."""
    if x.size == 0:
        # Still honor the "fresh output buffer" contract for empty inputs.
        return jnp.zeros(x.shape, x.dtype)

    num_chunks = 1
    chunk_rows = x.shape[0] if x.ndim >= 1 else 1
    nbytes = x.size * np.dtype(x.dtype).itemsize
    if (
        x.ndim >= 1
        and nbytes >= _CHUNK_THRESHOLD_BYTES
        and x.shape[0] >= _NUM_CHUNKS
        and x.shape[0] % _NUM_CHUNKS == 0
    ):
        num_chunks = _NUM_CHUNKS
        chunk_rows = x.shape[0] // _NUM_CHUNKS

    kernel = _make_dma_copy_kernel(num_chunks, chunk_rows)
    return pl.pallas_call(
        kernel,
        out_shape=jax.ShapeDtypeStruct(x.shape, x.dtype),
        in_specs=[pl.BlockSpec(memory_space=pl.ANY)],    # raw HBM ref
        out_specs=pl.BlockSpec(memory_space=pl.ANY),     # raw HBM ref
        scratch_shapes=[pltpu.SemaphoreType.DMA((num_chunks,))],
    )(x)


if __name__ == "__main__":
    key = jax.random.PRNGKey(0)
    # NCHW input, small shape consistent with a conv-style activation module.
    x = jax.random.normal(key, (2, 4, 16, 16), dtype=jnp.float32)
    x_host = np.asarray(jax.device_get(x))        # reference copy (x is donated)

    # Primary path: donate x so the aliased kernel is a true zero-copy no-op.
    y = jax.jit(identity_pallas, donate_argnums=0)(x)
    jax.block_until_ready(y)
    assert y.shape == x_host.shape, f"shape mismatch {y.shape} vs {x_host.shape}"
    assert y.dtype == jnp.float32
    assert np.array_equal(np.asarray(jax.device_get(y)), x_host), \
        "aliased identity output differs from input"

    # Secondary path: fresh-output copy via direct HBM->HBM DMA.
    x2 = jnp.asarray(x_host)
    y2 = jax.jit(identity_copy_pallas)(x2)
    jax.block_until_ready(y2)
    assert y2.shape == x2.shape and y2.dtype == x2.dtype
    assert bool(jnp.all(y2 == x2)), "copy identity output differs from input"

    print("KERNEL_OK")
</pallas_src>

<mosaic_0001>
module attributes {stable_mosaic.version = 11 : i64} {
  func.func @_identity_alias_kernel(%arg0: memref<2x4x16x16xf32, #tpu.memory_space<any>>, %arg1: memref<2x4x16x16xf32, #tpu.memory_space<any>>) attributes {dimension_semantics = [], scalar_prefetch = 0 : i64, scratch_operands = 0 : i64, tpu.core_type = #tpu.core_type<tc>} {
    return
  }
}

</mosaic_0001>

<bundles_post_ra>
// kernel: identity_pallas.1
= control target key start
LH: loop header
LB: loop body
LE: loop exit
PB: predicated region body
PF: predicated region fallthrough
CT: control target
= control target key end

     0   :  { %s16_s0 = inlined_call_operand.hbm [shape: f32[2,4,16,16], index: 0, kind: input, shape index: {}, may-alias: {0,1}]   ;;  %s17_s1 = inlined_call_operand.hbm [shape: f32[2,4,16,16], index: 1, kind: output, shape index: {}, may-alias: {0,1}]  }

</bundles_post_ra>
